<compile_context>
chip_gen: v7x
topology: tpu7x:2x2x1
jax: 0.10.0
libtpu: 0.0.40
codegen_flags: <defaults>
</compile_context>

<pallas_src>
import functools

import jax
import jax.numpy as jnp
from jax.experimental import pallas as pl
from jax.experimental.pallas import tpu as pltpu


def _ffn_kernel(x_ref, w1_ref, b1_ref, w2_ref, b2_ref, o_ref, acc_ref):
    # x_ref: (tm, C) bf16, w1_ref: (C, th) bf16, b1_ref: (1, th) f32,
    # w2_ref: (th, C) bf16, b2_ref: (1, C) f32, o_ref: (tm, C), acc_ref: (tm, C) f32
    k = pl.program_id(1)

    @pl.when(k == 0)
    def _():
        # Fold the output bias into the accumulator init (one broadcast total).
        acc_ref[...] = jnp.broadcast_to(b2_ref[...], acc_ref.shape)

    # First matmul on the MXU: bf16 x bf16 -> f32 accumulation.
    h = jnp.dot(x_ref[...], w1_ref[...], preferred_element_type=jnp.float32)
    # Hidden bias + ReLU on the f32 accumulator (safe on v5e: no bf16 VPU).
    h = jnp.maximum(h + b1_ref[...], 0.0)

    # Second matmul: partial reduction over this hidden tile, accumulated in f32.
    acc_ref[...] += jnp.dot(h.astype(jnp.bfloat16), w2_ref[...],
                            preferred_element_type=jnp.float32)

    @pl.when(k == pl.num_programs(1) - 1)
    def _():
        o_ref[...] = acc_ref[...].astype(o_ref.dtype)


@functools.partial(jax.jit, static_argnames=("tm", "th"))
def feed_forward(x, w1, b1, w2, b2, *, tm=None, th=None):
    """x: (B, T, C).  w1: (C, 4C), b1: (4C,), w2: (4C, C), b2: (C,)."""
    B, T, C = x.shape
    H = w1.shape[1]
    M = B * T

    # MXU-aligned tiles (256/512 for v6e/v7x; also multiples of 128 for v5e),
    # clamped for small/toy shapes.
    if tm is None:
        tm = 256 if M >= 256 else M
    if th is None:
        th = 512 if H >= 512 else H
    assert M % tm == 0 and H % th == 0
    assert tm == M or tm % 8 == 0          # (8, 128) sublane rule for f32/bf16 tiles

    # bf16 MXU operands; biases stay f32 (added to the f32 accumulator).
    x2 = x.reshape(M, C).astype(jnp.bfloat16)
    w1_bf = w1.astype(jnp.bfloat16)
    w2_bf = w2.astype(jnp.bfloat16)
    b1_2d = b1.reshape(1, H).astype(jnp.float32)
    b2_2d = b2.reshape(1, C).astype(jnp.float32)

    n_row_tiles = M // tm
    cost = pl.CostEstimate(
        flops=4 * M * C * H,                       # two (M,C,H) matmuls
        transcendentals=0,
        bytes_accessed=(M * C * 2                  # x (bf16)
                        + n_row_tiles * 2 * (C * H * 2)   # W1 + W2 restreamed per row tile
                        + (H + C) * 4              # biases
                        + M * C * 4),              # output (f32)
    )

    out = pl.pallas_call(
        _ffn_kernel,
        out_shape=jax.ShapeDtypeStruct((M, C), x.dtype),
        grid_spec=pltpu.PrefetchScalarGridSpec(
            num_scalar_prefetch=0,
            grid=(M // tm, H // th),               # hidden (reduction) axis last
            in_specs=[
                pl.BlockSpec((tm, C), lambda i, k: (i, 0)),   # x row tile (k-invariant)
                pl.BlockSpec((C, th), lambda i, k: (0, k)),   # W1 hidden tile
                pl.BlockSpec((1, th), lambda i, k: (0, k)),   # b1 hidden tile
                pl.BlockSpec((th, C), lambda i, k: (k, 0)),   # W2 hidden tile
                pl.BlockSpec((1, C), lambda i, k: (0, 0)),    # b2 (invariant)
            ],
            # Output block revisited across k -> accumulator; lane dim is C
            # (full embedding, lane-dense for real model sizes).
            out_specs=pl.BlockSpec((tm, C), lambda i, k: (i, 0)),
            scratch_shapes=[pltpu.VMEM((tm, C), jnp.float32)],
        ),
        compiler_params=pltpu.CompilerParams(
            dimension_semantics=("parallel", "arbitrary"),
            vmem_limit_bytes=48 * 1024 * 1024,     # headroom, still < v7x 64 MiB physical
        ),
        cost_estimate=cost,
    )(x2, w1_bf, b1_2d, w2_bf, b2_2d)

    return out.reshape(B, T, C)


def feed_forward_ref(x, w1, b1, w2, b2):
    # Reference with the same bf16 input rounding as the kernel, f32 accumulation.
    xb = x.astype(jnp.bfloat16).astype(jnp.float32)
    w1b = w1.astype(jnp.bfloat16).astype(jnp.float32)
    w2b = w2.astype(jnp.bfloat16).astype(jnp.float32)
    h = jnp.maximum(jnp.einsum("btc,ch->bth", xb, w1b,
                               preferred_element_type=jnp.float32) + b1, 0.0)
    h = h.astype(jnp.bfloat16).astype(jnp.float32)
    return jnp.einsum("bth,hc->btc", h, w2b,
                      preferred_element_type=jnp.float32) + b2


if __name__ == "__main__":
    # Small shapes consistent with the module: batch=2, seq=8, n_embed=32.
    B, T, C = 2, 8, 32
    H = 4 * C
    key = jax.random.PRNGKey(0)
    kx, k1, k2, k3, k4 = jax.random.split(key, 5)

    x = jax.random.normal(kx, (B, T, C), dtype=jnp.float32)

    # Deterministic parameter init (PyTorch-Linear-style uniform bounds),
    # stored pre-transposed as (in, out).
    bound1 = 1.0 / (C ** 0.5)
    bound2 = 1.0 / (H ** 0.5)
    w1 = jax.random.uniform(k1, (C, H), jnp.float32, -bound1, bound1)
    b1 = jax.random.uniform(k2, (H,), jnp.float32, -bound1, bound1)
    w2 = jax.random.uniform(k3, (H, C), jnp.float32, -bound2, bound2)
    b2 = jax.random.uniform(k4, (C,), jnp.float32, -bound2, bound2)

    out = feed_forward(x, w1, b1, w2, b2)
    out = jax.block_until_ready(out)

    ref = feed_forward_ref(x, w1, b1, w2, b2)
    assert out.shape == (B, T, C)
    assert jnp.allclose(out, ref, atol=1e-3, rtol=1e-3), "mismatch vs reference"

    print("KERNEL_OK")
</pallas_src>

<mosaic_0001>
module attributes {stable_mosaic.version = 11 : i64} {
  func.func @_ffn_kernel(%arg0: i32, %arg1: i32, %arg2: memref<16x32xbf16, #tpu.memory_space<vmem>>, %arg3: memref<32x128xbf16, #tpu.memory_space<vmem>>, %arg4: memref<1x128xf32, #tpu.memory_space<vmem>>, %arg5: memref<128x32xbf16, #tpu.memory_space<vmem>>, %arg6: memref<1x32xf32, #tpu.memory_space<vmem>>, %arg7: memref<16x32xf32, #tpu.memory_space<vmem>>, %arg8: memref<16x32xf32, #tpu.memory_space<vmem>>) attributes {dimension_semantics = [#tpu.dimension_semantics<parallel>, #tpu.dimension_semantics<arbitrary>], iteration_bounds = array<i64: 1, 1>, scalar_prefetch = 0 : i64, scratch_operands = 1 : i64, tpu.core_type = #tpu.core_type<tc>, window_params = [{transform_indices = @transform_0, window_bounds = array<i64: 16, 32>}, {transform_indices = @transform_1, window_bounds = array<i64: 32, 128>}, {transform_indices = @transform_2, window_bounds = array<i64: 1, 128>}, {transform_indices = @transform_3, window_bounds = array<i64: 128, 32>}, {pipeline_mode = #tpu.pipeline_mode<synchronous>, transform_indices = @transform_4, window_bounds = array<i64: 1, 32>}, {transform_indices = @transform_5, window_bounds = array<i64: 16, 32>}]} {
    %c0_i32 = arith.constant 0 : i32
    %0 = arith.cmpi eq, %arg1, %c0_i32 : i32
    %1 = arith.extui %0 : i1 to i32
    %c0_i32_0 = arith.constant 0 : i32
    %2 = arith.cmpi ne, %1, %c0_i32_0 : i32
    scf.if %2 {
      %c0_16 = arith.constant 0 : index
      %c0_17 = arith.constant 0 : index
      %20 = vector.load %arg6[%c0_16, %c0_17] : memref<1x32xf32, #tpu.memory_space<vmem>>, vector<1x32xf32>
      %21 = vector.shape_cast %20 : vector<1x32xf32> to vector<1x32xf32>
      %22 = vector.broadcast %21 : vector<1x32xf32> to vector<16x32xf32>
      %c0_18 = arith.constant 0 : index
      %c0_19 = arith.constant 0 : index
      %23 = vector.load %arg8[%c0_18, %c0_19] : memref<16x32xf32, #tpu.memory_space<vmem>>, vector<16x32xf32>
      tpu.vector_store %arg8[%c0_18, %c0_19], %22 {strides = array<i32>} : memref<16x32xf32, #tpu.memory_space<vmem>>, vector<16x32xf32>,
    } else {
    }
    %c0 = arith.constant 0 : index
    %c0_1 = arith.constant 0 : index
    %3 = vector.load %arg2[%c0, %c0_1] : memref<16x32xbf16, #tpu.memory_space<vmem>>, vector<16x32xbf16>
    %c0_2 = arith.constant 0 : index
    %c0_3 = arith.constant 0 : index
    %4 = vector.load %arg3[%c0_2, %c0_3] : memref<32x128xbf16, #tpu.memory_space<vmem>>, vector<32x128xbf16>
    %cst = arith.constant dense<0.000000e+00> : vector<16x128xf32>
    %5 = tpu.matmul %3, %4, %cst {dimension_numbers = #tpu.dot_dimension_numbers<[1], [0], [0], [1], [0, 0, 1, 1], [], []>} : vector<16x32xbf16>, vector<32x128xbf16>, vector<16x128xf32> -> vector<16x128xf32>
    %c0_4 = arith.constant 0 : index
    %c0_5 = arith.constant 0 : index
    %6 = vector.load %arg4[%c0_4, %c0_5] : memref<1x128xf32, #tpu.memory_space<vmem>>, vector<1x128xf32>
    %7 = vector.broadcast %6 : vector<1x128xf32> to vector<16x128xf32>
    %8 = arith.addf %5, %7 : vector<16x128xf32>
    %cst_6 = arith.constant 0.000000e+00 : f32
    %9 = vector.broadcast %cst_6 : f32 to vector<16x128xf32>
    %10 = arith.maximumf %8, %9 : vector<16x128xf32>
    %c0_7 = arith.constant 0 : index
    %c0_8 = arith.constant 0 : index
    %11 = vector.load %arg8[%c0_7, %c0_8] : memref<16x32xf32, #tpu.memory_space<vmem>>, vector<16x32xf32>
    %12 = arith.truncf %10 : vector<16x128xf32> to vector<16x128xbf16>
    %c0_9 = arith.constant 0 : index
    %c0_10 = arith.constant 0 : index
    %13 = vector.load %arg5[%c0_9, %c0_10] : memref<128x32xbf16, #tpu.memory_space<vmem>>, vector<128x32xbf16>
    %cst_11 = arith.constant dense<0.000000e+00> : vector<16x32xf32>
    %14 = tpu.matmul %12, %13, %cst_11 {dimension_numbers = #tpu.dot_dimension_numbers<[1], [0], [0], [1], [0, 0, 1, 1], [], []>} : vector<16x128xbf16>, vector<128x32xbf16>, vector<16x32xf32> -> vector<16x32xf32>
    %15 = arith.addf %11, %14 : vector<16x32xf32>
    %c0_12 = arith.constant 0 : index
    %c0_13 = arith.constant 0 : index
    %16 = vector.load %arg8[%c0_12, %c0_13] : memref<16x32xf32, #tpu.memory_space<vmem>>, vector<16x32xf32>
    tpu.vector_store %arg8[%c0_12, %c0_13], %15 {strides = array<i32>} : memref<16x32xf32, #tpu.memory_space<vmem>>, vector<16x32xf32>,
    %c0_i32_14 = arith.constant 0 : i32
    %17 = arith.cmpi eq, %arg1, %c0_i32_14 : i32
    %18 = arith.extui %17 : i1 to i32
    %c0_i32_15 = arith.constant 0 : i32
    %19 = arith.cmpi ne, %18, %c0_i32_15 : i32
    scf.if %19 {
      %c0_16 = arith.constant 0 : index
      %c0_17 = arith.constant 0 : index
      %20 = vector.load %arg8[%c0_16, %c0_17] : memref<16x32xf32, #tpu.memory_space<vmem>>, vector<16x32xf32>
      %c0_18 = arith.constant 0 : index
      %c0_19 = arith.constant 0 : index
      %21 = vector.load %arg7[%c0_18, %c0_19] : memref<16x32xf32, #tpu.memory_space<vmem>>, vector<16x32xf32>
      tpu.vector_store %arg7[%c0_18, %c0_19], %20 {strides = array<i32>} : memref<16x32xf32, #tpu.memory_space<vmem>>, vector<16x32xf32>,
    } else {
    }
    return
  }
  func.func @transform_0(%arg0: i32, %arg1: i32) -> (i32, i32) {
    %c0_i32 = arith.constant 0 : i32
    %c0_i32_0 = arith.constant 0 : i32
    return %arg0, %c0_i32 : i32, i32
  }
  func.func @transform_1(%arg0: i32, %arg1: i32) -> (i32, i32) {
    %c0_i32 = arith.constant 0 : i32
    %c0_i32_0 = arith.constant 0 : i32
    return %c0_i32, %arg1 : i32, i32
  }
  func.func @transform_2(%arg0: i32, %arg1: i32) -> (i32, i32) {
    %c0_i32 = arith.constant 0 : i32
    %c0_i32_0 = arith.constant 0 : i32
    return %c0_i32, %arg1 : i32, i32
  }
  func.func @transform_3(%arg0: i32, %arg1: i32) -> (i32, i32) {
    %c0_i32 = arith.constant 0 : i32
    %c0_i32_0 = arith.constant 0 : i32
    return %arg1, %c0_i32 : i32, i32
  }
  func.func @transform_4(%arg0: i32, %arg1: i32) -> (i32, i32) {
    %c0_i32 = arith.constant 0 : i32
    %c0_i32_0 = arith.constant 0 : i32
    %c0_i32_1 = arith.constant 0 : i32
    return %c0_i32, %c0_i32_0 : i32, i32
  }
  func.func @transform_5(%arg0: i32, %arg1: i32) -> (i32, i32) {
    %c0_i32 = arith.constant 0 : i32
    %c0_i32_0 = arith.constant 0 : i32
    return %arg0, %c0_i32 : i32, i32
  }
}

</mosaic_0001>

<bundles_post_ra>
// kernel: feed_forward.1
= control target key start
LH: loop header
LB: loop body
LE: loop exit
PB: predicated region body
PF: predicated region fallthrough
CT: control target
= control target key end

     0   :  { %v342_v1 = vmov 0.0   ;;  %vm343_vm0 = vmmov 0   ;;  %vm33_vm1 = vcmask 261120   ;;  %s435_s0 = inlined_call_operand.vmem [shape: bf16[16,32], index: 0, kind: input, shape index: {}]   ;;  %s436_s1 = inlined_call_operand.vmem [shape: bf16[32,128], index: 1, kind: input, shape index: {}]   ;;  %s437_s2 = inlined_call_operand.vmem [shape: f32[1,128], index: 2, kind: input, shape index: {}]   ;;  %s438_s3 = inlined_call_operand.vmem [shape: bf16[128,32], index: 3, kind: input, shape index: {}]   ;;  %s439_s4 = inlined_call_operand.vmem [shape: f32[1,32], index: 4, kind: input, shape index: {}]   ;;  %s440_s5 = inlined_call_operand.hbm [shape: f32[16,32], index: 5, kind: output, shape index: {}]  }
   0x1   :  { %v307_v0 = vld [vmem:[%s436_s1] sm:$0xff]   ;;  %274 = vmatprep.subr.bf16.mxu0 %v342_v1  ;;  %282 = vmatprep.subr.bf16.mxu1 %v342_v1  ;;  %v308_v2 = vld [vmem:[%s436_s1 + $0x8] sm:$0xff]   ;;  %v312_v6 = vld [vmem:[%s438_s3 + $0x10] sm:$0xff]  }
   0x2   :  { %275 = vmatpush3.bf16.msra.mxu0 %v307_v0  ;;  %278 = vmatprep.mubr.msk.bf16.mxu0 %vm343_vm0, %v342_v1  ;;  %v310_v3 = vld [vmem:[%s438_s3] sm:$0xff]   ;;  %v311_v5 = vld [vmem:[%s438_s3 + $0x8] sm:$0xff]  }
   0x3   :  { %276 = vmatprep.subr.bf16.mxu0 %v342_v1  ;;  %298 = vmatprep.mubr.msk.bf16.mxu1 %vm343_vm0, %v342_v1  ;;  %v309_v4 = vld [vmem:[%s435_s0] sm:$0xff]  }
   0x4   :  { %283 = vmatpush3.bf16.msra.mxu1 %v310_v3 }
   0x5   :  { %284 = vmatprep.subr.bf16.mxu1 %v342_v1 }
   0x6   :  { %277 = vmatpush3.bf16.msra.mxu0 %v308_v2 }
   0x8   :  { %285 = vmatpush3.bf16.msra.mxu1 %v311_v5 }
   0x9   :  { %279 = vmatmul.mubr.msk.bf16.vlgmr.msra.gmra.mrb[0].mxu0 %vm33_vm1, %v309_v4  ;;  %286 = vmatprep.subr.bf16.mxu1 %v342_v1 }
   0xa   :  { %10 = vsyncpa [#allocation4], 0  ;;  %v313_v7 = vld [vmem:[%s438_s3 + $0x18] sm:$0xff]   ;;  %v314_v8 = vld [vmem:[%s438_s3 + $0x20] sm:$0xff]  }
   0xb   :  { %v315_v9 = vld [vmem:[%s438_s3 + $0x28] sm:$0xff]   ;;  %v316_v10 = vld [vmem:[%s438_s3 + $0x30] sm:$0xff]   ;;  %v317_v11 = vld [vmem:[%s438_s3 + $0x38] sm:$0xff]  }
   0xc   :  { %287 = vmatpush3.bf16.msra.mxu1 %v312_v6  ;;  %v248_v12 = vld [vmem:[%s439_s4] ss:$0 sm:$0xff] }
   0xd   :  { %288 = vmatprep.subr.bf16.mxu1 %v342_v1  ;;  %34 = vst.msk [vmem:[#allocation2] sm:$0xff] %vm33_vm1, %v248_v12  ;;  %35 = vst.msk [vmem:[#allocation2 + $0x8] sm:$0xff] %vm33_vm1, %v248_v12  ;;  %v249_v13 = vld [vmem:[%s437_s2] ss:$0 sm:$0xff]  ;;  %s344_s2 = smov [#allocation3]  }
   0xe   :  { %s237_s3 = sshll.u32 %s344_s2, 4  ;;  %s238_s3 = int_to_ptr.vmem [resolvable:$true] %s237_s3 }
   0xf   :  { %s318_s4 = scalar_lea.vmem %s238_s3, 256  ;;  %p323_p1 = scmp.lt.s32.totalorder %s238_s3, %s238_s3 }
  0x10   :  { %289 = vmatpush3.bf16.msra.mxu1 %v313_v7  ;;  %p319_p0 = scmp.ne.s32.totalorder %s238_s3, %s318_s4  ;;  %p324_p2 = scmp.lt.s32.totalorder %s318_s4, %s318_s4 }
  0x11   :  { %290 = vmatprep.subr.bf16.mxu1 %v342_v1 }
  0x12   :  { %p325_p3 = por %p324_p2, %p323_p1 }
  0x14   :  { %291 = vmatpush3.bf16.msra.mxu1 %v314_v8  ;;  %v113_v23 = vld [vmem:[#allocation2] sm:$0xff]  ;;  %v114_v25 = vld [vmem:[#allocation2 + $0x8] sm:$0xff]  ;;  %p326_p4 = pnand %p325_p3, %p319_p0 }
  0x15   :  { %292 = vmatprep.subr.bf16.mxu1 %v342_v1 }
  0x18   :  { %293 = vmatpush3.bf16.msra.mxu1 %v315_v9 }
  0x19   :  { %294 = vmatprep.subr.bf16.mxu1 %v342_v1 }
  0x1c   :  { %295 = vmatpush3.bf16.msra.mxu1 %v316_v10 }
  0x1d   :  { %296 = vmatprep.subr.bf16.mxu1 %v342_v1 }
  0x20   :  { %297 = vmatpush3.bf16.msra.mxu1 %v317_v11 }
  0xdc   :  { %v104_v14 = vpop.f32.mrb[0].mxu0 }
  0xdd   :  { %v105_v15 = vadd.f32 %v249_v13, %v104_v14  ;;  %v280_v16 = vpop.f32.mrb[1].mxu0 }
  0xde   :  { %v107_v17 = vpop.f32.mrb[2].mxu0 }
  0xdf   :  { %v108_v18 = vadd.f32 %v249_v13, %v107_v17  ;;  %v281_v19 = vpop.f32.mrb[3].mxu0  ;;  %v111_v20 = vmax.f32 %v105_v15, 0.0 }
  0xe1   :  { %v112_v21 = vmax.f32 %v108_v18, 0.0 }
  0xe3   :  { %v115_v22 = vpack.c.bf16 %v112_v21, %v111_v20 }
  0xe5   :  { %299 = vmatmul.mubr.bf16.vlgmr.msra.gmra.mrb[0].mxu1 %v115_v22 }
 0x1b8   :  { %v214_v24 = vpop.f32.mrb[0].mxu1 }
 0x1b9   :  { %v221_v26 = vadd.f32 %v214_v24, %v113_v23  ;;  %v300_v27 = vpop.f32.mrb[1].mxu1 }
 0x1ba   :  { %v217_v28 = vpop.f32.mrb[2].mxu1 }
 0x1bb   :  { %223 = vst.msk [vmem:[#allocation2] sm:$0xff] %vm33_vm1, %v221_v26  ;;  %v222_v29 = vadd.f32 %v217_v28, %v114_v25  ;;  %v301_v30 = vpop.f32.mrb[3].mxu1 }
 0x1bd   :  { %224 = vst.msk [vmem:[#allocation2 + $0x8] sm:$0xff] %vm33_vm1, %v222_v29 }
 0x1c2   :  { %v228_v31 = vld [vmem:[#allocation2] sm:$0xff] }
 0x1c3   :  { %230 = vst.msk [vmem:[#allocation3] sm:$0xff] %vm33_vm1, %v228_v31 }
 0x1c4   :  { %v229_v32 = vld [vmem:[#allocation2 + $0x8] sm:$0xff] }
 0x1c5   :  { %231 = vst.msk [vmem:[#allocation3 + $0x8] sm:$0xff] %vm33_vm1, %v229_v32 }
 0x1c6   :  { %329 = shalt.err (!%p326_p4)
}
 0x1c7   :  { %s330_s19 = scalar_lea.hbm %s440_s5, 256 }
 0x1c8   :  { %p331_p5 = scmp.ne.s32.totalorder %s440_s5, %s330_s19  ;;  %p334_p6 = scmp.lt.u32.totalorder %s330_s19, %s440_s5 }
 0x1ca   :  { %p336_p7 = pnand %p334_p6, %p331_p5 }
 0x1cc   :  { %339 = shalt.err (!%p336_p7)
}
 0x1cd   :  { %s345_s24 = smov 128   ;;  %s346_s25 = smov 8  }
 0x1ce   :  { %243 = dma.vmem_to_hbm [thread:$0]  %s238_s3, 256, %s440_s5, [#allocation4], %s345_s24, %s345_s24, %s346_s25  }
 0x1cf   :  { %340 = dma.done.wait [#allocation4], 256  }
 0x1d0   :  { %341 = vsyncadd [#allocation4], 4294967040 }
 0x1d1   :  { %247 = vsyncpa [#allocation4], 1 }

</bundles_post_ra>
